<compile_context>
chip_gen: v7x
topology: tpu7x:2x2x1
jax: 0.10.0
libtpu: 0.0.40
codegen_flags: <defaults>
</compile_context>

<pallas_src>
import math
from functools import partial

import jax
import jax.numpy as jnp
from jax import lax
from jax.experimental import pallas as pl
from jax.experimental.pallas import tpu as pltpu


# ----------------------------------------------------------------------------
# Tile helpers
# ----------------------------------------------------------------------------
def _leading_tile(dim, cap):
    """Largest divisor of `dim` that is <= cap (outer grid-tiled dim)."""
    t = max(1, min(dim, cap))
    while dim % t != 0:
        t -= 1
    return t


def _minor_tile(dim, cap):
    """Tile for one of the last-two block dims: a multiple of 128 dividing
    `dim`, or the full dim itself (both are legal TPU block shapes)."""
    if dim <= cap or dim % 128 != 0:
        return dim
    t = (min(cap, dim) // 128) * 128
    while t >= 128:
        if dim % t == 0:
            return t
        t -= 128
    return dim


# ----------------------------------------------------------------------------
# Kernel 1: fused gate path  (mean-pool over L  ->  LayerNorm  ->  linear(l_w)
#                             ->  gate MLP linear  ->  ReLU)
# ----------------------------------------------------------------------------
def _gate_kernel(x_ref, g_ref, be_ref, lw_ref, lb_ref, w1_ref, b1_ref,
                 logits_ref, acc_ref, *, inv_l, eps):
    # Grid: (L // tl,)  -- sequential reduction over L tiles.
    @pl.when(pl.program_id(0) == 0)
    def _init():
        acc_ref[...] = jnp.zeros_like(acc_ref)

    # Accumulate the sum over the sequence dimension of this L tile.
    acc_ref[...] += jnp.sum(x_ref[...], axis=0)          # (N, C)

    @pl.when(pl.program_id(0) == pl.num_programs(0) - 1)
    def _finalize():
        x_avg = acc_ref[...] * inv_l                      # mean over L, (N, C)
        mu = jnp.mean(x_avg, axis=-1, keepdims=True)
        xc = x_avg - mu
        var = jnp.mean(xc * xc, axis=-1, keepdims=True)
        x_norm = xc * lax.rsqrt(var + eps) * g_ref[...] + be_ref[...]
        # gate_in = x_norm @ l_w.T + l_b   (contract trailing dims, no transpose)
        gate_in = lax.dot_general(
            x_norm, lw_ref[...], (((1,), (1,)), ((), ())),
            preferred_element_type=jnp.float32) + lb_ref[...]
        # MLP: ReLU(gate_in @ W1.T + b1)
        h = lax.dot_general(
            gate_in, w1_ref[...], (((1,), (1,)), ((), ())),
            preferred_element_type=jnp.float32) + b1_ref[...]
        logits_ref[...] = jnp.maximum(h, 0.0)


def gate_logits(x, l_w, l_b, ln_g, ln_b, gp_w, gp_b, *, eps=1e-5, l_tile=128):
    """Fused pool + LayerNorm + gate linear + gate MLP.  x: (L, N, C) -> (N, O)."""
    L, N, C = x.shape
    O = l_w.shape[0]
    tl = _leading_tile(L, l_tile)
    kernel = partial(_gate_kernel, inv_l=1.0 / L, eps=eps)
    return pl.pallas_call(
        kernel,
        out_shape=jax.ShapeDtypeStruct((N, O), jnp.float32),
        grid_spec=pltpu.PrefetchScalarGridSpec(
            num_scalar_prefetch=0,
            grid=(L // tl,),
            in_specs=[
                pl.BlockSpec((tl, N, C), lambda i: (i, 0, 0)),
                pl.BlockSpec((1, C), lambda i: (0, 0)),
                pl.BlockSpec((1, C), lambda i: (0, 0)),
                pl.BlockSpec((O, C), lambda i: (0, 0)),
                pl.BlockSpec((1, O), lambda i: (0, 0)),
                pl.BlockSpec((O, O), lambda i: (0, 0)),
                pl.BlockSpec((1, O), lambda i: (0, 0)),
            ],
            out_specs=pl.BlockSpec((N, O), lambda i: (0, 0)),
            scratch_shapes=[pltpu.VMEM((N, C), jnp.float32)],
        ),
        compiler_params=pltpu.CompilerParams(
            dimension_semantics=("arbitrary",)),
    )(x.astype(jnp.float32),
      ln_g.reshape(1, C), ln_b.reshape(1, C),
      l_w, l_b.reshape(1, O),
      gp_w, gp_b.reshape(1, O))


# ----------------------------------------------------------------------------
# Kernel 2: fused masked linear  out[l,n,o] = mask[n,o] * (x[l,n,:].w[o,:]+b[o])
# ----------------------------------------------------------------------------
def _masked_linear_kernel(x_ref, w_ref, b_ref, m_ref, o_ref, acc_ref):
    # Grid: (L // tl, O // tn, C // tk); K (reduction) axis last.
    @pl.when(pl.program_id(2) == 0)
    def _init():
        acc_ref[...] = jnp.zeros_like(acc_ref)

    w = w_ref[...]                                        # (tn, tk)
    n = x_ref.shape[1]                                    # full (small) batch N
    for s in range(n):                                    # static batch loop
        xs = x_ref[:, s, :]                               # (tl, tk)
        # xs @ w.T via trailing-dim contraction (no transpose op).
        acc_ref[:, s, :] = acc_ref[:, s, :] + lax.dot_general(
            xs, w, (((1,), (1,)), ((), ())),
            preferred_element_type=jnp.float32)           # (tl, tn)

    @pl.when(pl.program_id(2) == pl.num_programs(2) - 1)
    def _finalize():
        y = acc_ref[...] + b_ref[...][None, :, :]         # (tl,N,tn)+(1,1,tn)
        o_ref[...] = (y * m_ref[...][None, :, :]).astype(o_ref.dtype)


def masked_linear(x, w, b, mask, *, l_tile=128, o_tile=512, k_tile=512):
    """x: (L, N, C), w: (O, C), b: (O,), mask: (N, O) -> (L, N, O)."""
    L, N, C = x.shape
    O = w.shape[0]
    tl = _leading_tile(L, l_tile)
    tn = _minor_tile(O, o_tile)
    tk = _minor_tile(C, k_tile)
    return pl.pallas_call(
        _masked_linear_kernel,
        out_shape=jax.ShapeDtypeStruct((L, N, O), jnp.float32),
        grid_spec=pltpu.PrefetchScalarGridSpec(
            num_scalar_prefetch=0,
            grid=(L // tl, O // tn, C // tk),
            in_specs=[
                pl.BlockSpec((tl, N, tk), lambda li, oi, ki: (li, 0, ki)),
                pl.BlockSpec((tn, tk), lambda li, oi, ki: (oi, ki)),
                pl.BlockSpec((1, tn), lambda li, oi, ki: (0, oi)),
                pl.BlockSpec((N, tn), lambda li, oi, ki: (0, oi)),
            ],
            out_specs=pl.BlockSpec((tl, N, tn), lambda li, oi, ki: (li, 0, oi)),
            scratch_shapes=[pltpu.VMEM((tl, N, tn), jnp.float32)],
        ),
        compiler_params=pltpu.CompilerParams(
            dimension_semantics=("parallel", "parallel", "arbitrary")),
    )(x.astype(jnp.float32), w, b.reshape(1, O), mask)


# ----------------------------------------------------------------------------
# Module-equivalent wrapper
# ----------------------------------------------------------------------------
class DGLLayer:
    """JAX/Pallas port of the PyTorch Dynamic Gated Linear Layer (eval forward)."""

    def __init__(self, in_features, out_features, top_r=0.5, fast=False,
                 key=None, eps=1e-5, max_l_tile=128, max_k_tile=512,
                 max_o_tile=512):
        self.in_features = in_features
        self.out_features = out_features
        self.top_k = int(out_features * top_r)
        self.fast = fast
        self.eps = eps
        self.max_l_tile = max_l_tile
        self.max_k_tile = max_k_tile
        self.max_o_tile = max_o_tile
        self.loss = 0.0
        self.last_gate_logits = None

        key = key if key is not None else jax.random.PRNGKey(0)
        k1, k2 = jax.random.split(key)

        # LayerNorm(in_features): default PyTorch init (weight=1, bias=0).
        self.ln_gamma = jnp.ones((in_features,), jnp.float32)
        self.ln_beta = jnp.zeros((in_features,), jnp.float32)

        # gate_predictor = MLP(out_features, out_features) = Linear + ReLU.
        bound = 1.0 / math.sqrt(out_features)
        self.gp_weight = jax.random.uniform(
            k1, (out_features, out_features),
            minval=-bound, maxval=bound, dtype=jnp.float32)
        self.gp_bias = jax.random.uniform(
            k2, (out_features,),
            minval=-bound, maxval=bound, dtype=jnp.float32)

    def set_topr(self, top_r):
        assert 0.0 <= top_r <= 1.0
        self.top_k = int(self.out_features * top_r)

    def get_loss(self):
        return self.loss

    def __call__(self, x, l_w, l_b=None, training=False):
        if self.fast:
            return self.forward_fast(x, l_w, l_b)
        return self.forward_dynamic(x, l_w, l_b, training)

    def forward_fast(self, x, l_w, l_b=None):
        if x.ndim == 2:
            x = x[:, None, :]
        L, N, _ = x.shape
        k = self.top_k
        w = l_w[:k]
        b = l_b[:k] if l_b is not None else jnp.zeros((k,), jnp.float32)
        ones_mask = jnp.ones((N, k), jnp.float32)
        y = masked_linear(x, w, b, ones_mask, l_tile=self.max_l_tile,
                          o_tile=self.max_o_tile, k_tile=self.max_k_tile)
        idx = jnp.tile(jnp.arange(k, dtype=jnp.int32)[None, :], (N, 1))
        return y, idx

    def forward_dynamic(self, x, l_w, l_b=None, training=False):
        if x.ndim == 2:                       # unbatched (L, C) -> (L, 1, C)
            x = x[:, None, :]
        L, N, _ = x.shape
        O = self.out_features
        if self.top_k == 0:
            return (jnp.zeros((L, N, O), jnp.float32),
                    jnp.zeros((0, 0), jnp.int32))

        b = l_b if l_b is not None else jnp.zeros((O,), jnp.float32)

        # Fused gate path (Pallas kernel 1).
        logits = gate_logits(x, l_w, b, self.ln_gamma, self.ln_beta,
                             self.gp_weight, self.gp_bias,
                             eps=self.eps, l_tile=self.max_l_tile)
        self.last_gate_logits = logits
        if training:
            self.loss = jnp.sum(jnp.abs(logits))   # L1 gate loss (plain jnp)

        # Data-dependent channel selection (JAX level; no Pallas top-k prim).
        _, indices = jax.lax.top_k(logits, self.top_k)           # (N, top_k)
        mask = jnp.zeros((N, O), jnp.float32).at[
            jnp.arange(N)[:, None], indices].set(1.0)

        # Fused masked linear (Pallas kernel 2).
        out = masked_linear(x, l_w, b, mask, l_tile=self.max_l_tile,
                            o_tile=self.max_o_tile, k_tile=self.max_k_tile)
        return out, indices


# ----------------------------------------------------------------------------
# Pure-JAX references for correctness checking
# ----------------------------------------------------------------------------
def _reference_gate_logits(x, l_w, l_b, ln_g, ln_b, gp_w, gp_b, eps):
    x_avg = jnp.mean(x, axis=0)                            # (N, C)
    mu = jnp.mean(x_avg, axis=-1, keepdims=True)
    var = jnp.mean((x_avg - mu) ** 2, axis=-1, keepdims=True)
    x_norm = (x_avg - mu) / jnp.sqrt(var + eps) * ln_g + ln_b
    gate_in = x_norm @ l_w.T + (l_b if l_b is not None else 0.0)
    return jax.nn.relu(gate_in @ gp_w.T + gp_b)


def _reference_masked_linear(x, l_w, l_b, indices, out_features):
    y = jnp.einsum("lnc,oc->lno", x, l_w)
    if l_b is not None:
        y = y + l_b[None, None, :]
    N = x.shape[1]
    mask = jnp.zeros((N, out_features), y.dtype).at[
        jnp.arange(N)[:, None], indices].set(1.0)
    return y * mask[None]


# ----------------------------------------------------------------------------
if __name__ == "__main__":
    in_features = 32
    out_features = 32
    seq_len = 16
    batch = 2

    root = jax.random.PRNGKey(0)
    kx, kw, kb, km = jax.random.split(root, 4)

    x = jax.random.normal(kx, (seq_len, batch, in_features), jnp.float32)
    l_w = 0.1 * jax.random.normal(kw, (out_features, in_features), jnp.float32)
    l_b = 0.1 * jax.random.normal(kb, (out_features,), jnp.float32)

    # Small L tile so the demo exercises the multi-step reduction grids.
    layer = DGLLayer(in_features, out_features, top_r=0.5, key=km, max_l_tile=8)

    out, indices = layer(x, l_w, l_b)
    out = jax.block_until_ready(out)
    indices = jax.block_until_ready(indices)

    assert out.shape == (seq_len, batch, out_features)
    assert indices.shape == (batch, layer.top_k)

    # Gate path: fused pool + LayerNorm + linear + MLP/ReLU vs pure-jnp ref.
    logits_ref = _reference_gate_logits(
        x, l_w, l_b, layer.ln_gamma, layer.ln_beta,
        layer.gp_weight, layer.gp_bias, layer.eps)
    assert jnp.allclose(layer.last_gate_logits, logits_ref,
                        atol=1e-4, rtol=1e-4), "gate logits mismatch"

    # Masked linear vs pure-jnp reference using the selected channels.
    out_ref = _reference_masked_linear(x, l_w, l_b, indices, out_features)
    assert jnp.allclose(out, out_ref, atol=1e-4, rtol=1e-4), "output mismatch"

    # Non-selected channels must be exactly zero.
    sel_mask = jnp.zeros((batch, out_features)).at[
        jnp.arange(batch)[:, None], indices].set(1.0)
    assert jnp.all(jnp.where(sel_mask[None] == 0.0, out, 0.0) == 0.0)

    print("KERNEL_OK")
</pallas_src>

<mosaic_0001>
module attributes {stable_mosaic.version = 11 : i64} {
  func.func @_gate_kernel(%arg0: i32, %arg1: memref<8x2x32xf32, #tpu.memory_space<vmem>>, %arg2: memref<1x32xf32, #tpu.memory_space<vmem>>, %arg3: memref<1x32xf32, #tpu.memory_space<vmem>>, %arg4: memref<32x32xf32, #tpu.memory_space<vmem>>, %arg5: memref<1x32xf32, #tpu.memory_space<vmem>>, %arg6: memref<32x32xf32, #tpu.memory_space<vmem>>, %arg7: memref<1x32xf32, #tpu.memory_space<vmem>>, %arg8: memref<2x32xf32, #tpu.memory_space<vmem>>, %arg9: memref<2x32xf32, #tpu.memory_space<vmem>>) attributes {dimension_semantics = [#tpu.dimension_semantics<arbitrary>], iteration_bounds = array<i64: 2>, scalar_prefetch = 0 : i64, scratch_operands = 1 : i64, tpu.core_type = #tpu.core_type<tc>, window_params = [{transform_indices = @transform_0, window_bounds = array<i64: 8, 2, 32>}, {pipeline_mode = #tpu.pipeline_mode<synchronous>, transform_indices = @transform_1, window_bounds = array<i64: 1, 32>}, {pipeline_mode = #tpu.pipeline_mode<synchronous>, transform_indices = @transform_2, window_bounds = array<i64: 1, 32>}, {pipeline_mode = #tpu.pipeline_mode<synchronous>, transform_indices = @transform_3, window_bounds = array<i64: 32, 32>}, {pipeline_mode = #tpu.pipeline_mode<synchronous>, transform_indices = @transform_4, window_bounds = array<i64: 1, 32>}, {pipeline_mode = #tpu.pipeline_mode<synchronous>, transform_indices = @transform_5, window_bounds = array<i64: 32, 32>}, {pipeline_mode = #tpu.pipeline_mode<synchronous>, transform_indices = @transform_6, window_bounds = array<i64: 1, 32>}, {pipeline_mode = #tpu.pipeline_mode<synchronous>, transform_indices = @transform_7, window_bounds = array<i64: 2, 32>}]} {
    %c0_i32 = arith.constant 0 : i32
    %0 = arith.cmpi eq, %arg0, %c0_i32 : i32
    %1 = arith.extui %0 : i1 to i32
    %c0_i32_0 = arith.constant 0 : i32
    %2 = arith.cmpi ne, %1, %c0_i32_0 : i32
    scf.if %2 {
      %cst_8 = arith.constant 0.000000e+00 : f32
      %11 = vector.broadcast %cst_8 : f32 to vector<2x32xf32>
      %c0_9 = arith.constant 0 : index
      %c0_10 = arith.constant 0 : index
      %12 = vector.load %arg9[%c0_9, %c0_10] : memref<2x32xf32, #tpu.memory_space<vmem>>, vector<2x32xf32>
      tpu.vector_store %arg9[%c0_9, %c0_10], %11 {strides = array<i32>} : memref<2x32xf32, #tpu.memory_space<vmem>>, vector<2x32xf32>,
    } else {
    }
    %c0 = arith.constant 0 : index
    %c0_1 = arith.constant 0 : index
    %3 = vector.load %arg9[%c0, %c0_1] : memref<2x32xf32, #tpu.memory_space<vmem>>, vector<2x32xf32>
    %c0_2 = arith.constant 0 : index
    %c0_3 = arith.constant 0 : index
    %c0_4 = arith.constant 0 : index
    %4 = vector.load %arg1[%c0_2, %c0_3, %c0_4] : memref<8x2x32xf32, #tpu.memory_space<vmem>>, vector<8x2x32xf32>
    %cst = arith.constant dense<0.000000e+00> : vector<2x32xf32>
    %5 = vector.multi_reduction <add>, %4, %cst [0] : vector<8x2x32xf32> to vector<2x32xf32>
    %6 = arith.addf %3, %5 : vector<2x32xf32>
    %c0_5 = arith.constant 0 : index
    %c0_6 = arith.constant 0 : index
    %7 = vector.load %arg9[%c0_5, %c0_6] : memref<2x32xf32, #tpu.memory_space<vmem>>, vector<2x32xf32>
    tpu.vector_store %arg9[%c0_5, %c0_6], %6 {strides = array<i32>} : memref<2x32xf32, #tpu.memory_space<vmem>>, vector<2x32xf32>,
    %c1_i32 = arith.constant 1 : i32
    %8 = arith.cmpi eq, %arg0, %c1_i32 : i32
    %9 = arith.extui %8 : i1 to i32
    %c0_i32_7 = arith.constant 0 : i32
    %10 = arith.cmpi ne, %9, %c0_i32_7 : i32
    scf.if %10 {
      %c0_8 = arith.constant 0 : index
      %c0_9 = arith.constant 0 : index
      %11 = vector.load %arg9[%c0_8, %c0_9] : memref<2x32xf32, #tpu.memory_space<vmem>>, vector<2x32xf32>
      %cst_10 = arith.constant 6.250000e-02 : f32
      %12 = vector.broadcast %cst_10 : f32 to vector<2x32xf32>
      %13 = arith.mulf %11, %12 : vector<2x32xf32>
      %cst_11 = arith.constant dense<0.000000e+00> : vector<2xf32>
      %14 = vector.multi_reduction <add>, %13, %cst_11 [1] : vector<2x32xf32> to vector<2xf32>
      %15 = vector.shape_cast %14 : vector<2xf32> to vector<2x1xf32>
      %cst_12 = arith.constant 3.200000e+01 : f32
      %16 = vector.broadcast %cst_12 : f32 to vector<2x1xf32>
      %17 = arith.divf %15, %16 : vector<2x1xf32>
      %18 = vector.broadcast %17 : vector<2x1xf32> to vector<2x32xf32>
      %19 = arith.subf %13, %18 : vector<2x32xf32>
      %20 = arith.mulf %19, %19 : vector<2x32xf32>
      %cst_13 = arith.constant dense<0.000000e+00> : vector<2xf32>
      %21 = vector.multi_reduction <add>, %20, %cst_13 [1] : vector<2x32xf32> to vector<2xf32>
      %22 = vector.shape_cast %21 : vector<2xf32> to vector<2x1xf32>
      %cst_14 = arith.constant 3.200000e+01 : f32
      %23 = vector.broadcast %cst_14 : f32 to vector<2x1xf32>
      %24 = arith.divf %22, %23 : vector<2x1xf32>
      %cst_15 = arith.constant 9.99999974E-6 : f32
      %25 = vector.broadcast %cst_15 : f32 to vector<2x1xf32>
      %26 = arith.addf %24, %25 : vector<2x1xf32>
      %27 = math.rsqrt %26 : vector<2x1xf32>
      %28 = vector.broadcast %27 : vector<2x1xf32> to vector<2x32xf32>
      %29 = arith.mulf %19, %28 : vector<2x32xf32>
      %c0_16 = arith.constant 0 : index
      %c0_17 = arith.constant 0 : index
      %30 = vector.load %arg2[%c0_16, %c0_17] : memref<1x32xf32, #tpu.memory_space<vmem>>, vector<1x32xf32>
      %31 = vector.broadcast %30 : vector<1x32xf32> to vector<2x32xf32>
      %32 = arith.mulf %29, %31 : vector<2x32xf32>
      %c0_18 = arith.constant 0 : index
      %c0_19 = arith.constant 0 : index
      %33 = vector.load %arg3[%c0_18, %c0_19] : memref<1x32xf32, #tpu.memory_space<vmem>>, vector<1x32xf32>
      %34 = vector.broadcast %33 : vector<1x32xf32> to vector<2x32xf32>
      %35 = arith.addf %32, %34 : vector<2x32xf32>
      %c0_20 = arith.constant 0 : index
      %c0_21 = arith.constant 0 : index
      %36 = vector.load %arg4[%c0_20, %c0_21] : memref<32x32xf32, #tpu.memory_space<vmem>>, vector<32x32xf32>
      %cst_22 = arith.constant dense<0.000000e+00> : vector<2x32xf32>
      %37 = tpu.matmul %35, %36, %cst_22 {dimension_numbers = #tpu.dot_dimension_numbers<[1], [1], [0], [0], [0, 0, 1, 0], [], []>} : vector<2x32xf32>, vector<32x32xf32>, vector<2x32xf32> -> vector<2x32xf32>
      %c0_23 = arith.constant 0 : index
      %c0_24 = arith.constant 0 : index
      %38 = vector.load %arg5[%c0_23, %c0_24] : memref<1x32xf32, #tpu.memory_space<vmem>>, vector<1x32xf32>
      %39 = vector.broadcast %38 : vector<1x32xf32> to vector<2x32xf32>
      %40 = arith.addf %37, %39 : vector<2x32xf32>
      %c0_25 = arith.constant 0 : index
      %c0_26 = arith.constant 0 : index
      %41 = vector.load %arg6[%c0_25, %c0_26] : memref<32x32xf32, #tpu.memory_space<vmem>>, vector<32x32xf32>
      %cst_27 = arith.constant dense<0.000000e+00> : vector<2x32xf32>
      %42 = tpu.matmul %40, %41, %cst_27 {dimension_numbers = #tpu.dot_dimension_numbers<[1], [1], [0], [0], [0, 0, 1, 0], [], []>} : vector<2x32xf32>, vector<32x32xf32>, vector<2x32xf32> -> vector<2x32xf32>
      %c0_28 = arith.constant 0 : index
      %c0_29 = arith.constant 0 : index
      %43 = vector.load %arg7[%c0_28, %c0_29] : memref<1x32xf32, #tpu.memory_space<vmem>>, vector<1x32xf32>
      %44 = vector.broadcast %43 : vector<1x32xf32> to vector<2x32xf32>
      %45 = arith.addf %42, %44 : vector<2x32xf32>
      %cst_30 = arith.constant 0.000000e+00 : f32
      %46 = vector.broadcast %cst_30 : f32 to vector<2x32xf32>
      %47 = arith.maximumf %45, %46 : vector<2x32xf32>
      %c0_31 = arith.constant 0 : index
      %c0_32 = arith.constant 0 : index
      %48 = vector.load %arg8[%c0_31, %c0_32] : memref<2x32xf32, #tpu.memory_space<vmem>>, vector<2x32xf32>
      tpu.vector_store %arg8[%c0_31, %c0_32], %47 {strides = array<i32>} : memref<2x32xf32, #tpu.memory_space<vmem>>, vector<2x32xf32>,
    } else {
    }
    return
  }
  func.func @transform_0(%arg0: i32) -> (i32, i32, i32) {
    %c0_i32 = arith.constant 0 : i32
    %c0_i32_0 = arith.constant 0 : i32
    %c0_i32_1 = arith.constant 0 : i32
    return %arg0, %c0_i32, %c0_i32_0 : i32, i32, i32
  }
  func.func @transform_1(%arg0: i32) -> (i32, i32) {
    %c0_i32 = arith.constant 0 : i32
    %c0_i32_0 = arith.constant 0 : i32
    %c0_i32_1 = arith.constant 0 : i32
    return %c0_i32, %c0_i32_0 : i32, i32
  }
  func.func @transform_2(%arg0: i32) -> (i32, i32) {
    %c0_i32 = arith.constant 0 : i32
    %c0_i32_0 = arith.constant 0 : i32
    %c0_i32_1 = arith.constant 0 : i32
    return %c0_i32, %c0_i32_0 : i32, i32
  }
  func.func @transform_3(%arg0: i32) -> (i32, i32) {
    %c0_i32 = arith.constant 0 : i32
    %c0_i32_0 = arith.constant 0 : i32
    %c0_i32_1 = arith.constant 0 : i32
    return %c0_i32, %c0_i32_0 : i32, i32
  }
  func.func @transform_4(%arg0: i32) -> (i32, i32) {
    %c0_i32 = arith.constant 0 : i32
    %c0_i32_0 = arith.constant 0 : i32
    %c0_i32_1 = arith.constant 0 : i32
    return %c0_i32, %c0_i32_0 : i32, i32
  }
  func.func @transform_5(%arg0: i32) -> (i32, i32) {
    %c0_i32 = arith.constant 0 : i32
    %c0_i32_0 = arith.constant 0 : i32
    %c0_i32_1 = arith.constant 0 : i32
    return %c0_i32, %c0_i32_0 : i32, i32
  }
  func.func @transform_6(%arg0: i32) -> (i32, i32) {
    %c0_i32 = arith.constant 0 : i32
    %c0_i32_0 = arith.constant 0 : i32
    %c0_i32_1 = arith.constant 0 : i32
    return %c0_i32, %c0_i32_0 : i32, i32
  }
  func.func @transform_7(%arg0: i32) -> (i32, i32) {
    %c0_i32 = arith.constant 0 : i32
    %c0_i32_0 = arith.constant 0 : i32
    %c0_i32_1 = arith.constant 0 : i32
    return %c0_i32, %c0_i32_0 : i32, i32
  }
}

</mosaic_0001>

<bundles_post_ra>
// kernel: tpu_custom_call.1
= control target key start
LH: loop header
LB: loop body
LE: loop exit
PB: predicated region body
PF: predicated region fallthrough
CT: control target
= control target key end

     0   :  { %12 = vsyncpa [#allocation4], 0  ;;  %s1258_s0 = inlined_call_operand.hbm [shape: f32[16,2,32], index: 0, kind: input, shape index: {}]   ;;  %s1259_s1 = inlined_call_operand.vmem [shape: f32[1,32], index: 1, kind: input, shape index: {}]   ;;  %s1260_s2 = inlined_call_operand.vmem [shape: f32[1,32], index: 2, kind: input, shape index: {}]   ;;  %s1261_s3 = inlined_call_operand.hbm [shape: f32[32,32], index: 3, kind: input, shape index: {}]   ;;  %s1262_s4 = inlined_call_operand.vmem [shape: f32[1,32], index: 4, kind: input, shape index: {}]   ;;  %s1263_s5 = inlined_call_operand.hbm [shape: f32[32,32], index: 5, kind: input, shape index: {}]   ;;  %s1264_s6 = inlined_call_operand.vmem [shape: f32[1,32], index: 6, kind: input, shape index: {}]   ;;  %s1265_s7 = inlined_call_operand.hbm [shape: f32[2,32], index: 7, kind: output, shape index: {}]  }
   0x1   :  { %14 = vsyncpa [#allocation4 + $0x1], 0 }
   0x2   :  { %15 = vsyncpa [#allocation7], 0 }
   0x3   :  { %16 = vsyncpa [#allocation5], 0  ;;  %s1021_s24 = smov 0   ;;  %s1023_s25 = smov 0  }
   0x4   :  { %s1025_s26 = smov 0   ;;  %s1027_s27 = smov 0  }
   0x5 LB: > { %s1040_s28 = sadd.s32 4294967295, %s967_s27   ;;  %p42_p0 = scmp.ne.s32.totalorder %s959_s25, %s955_s24  ;;  %s967_s27 = sphi %s1027_s27, %s1283_s27   ;;  %s963_s26 = sphi %s1025_s26, %s1282_s26   ;;  %s959_s25 = sphi %s1023_s25, %s1281_s25   ;;  %s955_s24 = sphi %s1021_s24, %s1280_s24  }
   0x6   : > { %p1266_p1 = scmp.eq.s32.totalorder %s1040_s28, 0  ;;  %p656_p2 = scmp.ge.s32.totalorder %s967_s27, 1 }
   0x7   : > { %p200_p3 = scmp.lt.s32.totalorder %s967_s27, 3  ;;  %s969_s8 = smov [#allocation6]  }
   0x8   : > { %p1049_p5 = por %p1266_p1, %p42_p0  ;;  %s218_s9 = sshll.u32 %s969_s8, 4  ;;  %s219_s9 = int_to_ptr.vmem [resolvable:$true] %s218_s9 }
   0x9   : > { %p1053_p6 = pnand %p656_p2, %p200_p3  ;;  %s970_s11 = smov [#allocation8]  }
   0xa   : > { %s1269_s29 = scalar_select %p1049_p5, 1, 0 }
   0xb   : > { %s1270_s30 = scalar_select %p1053_p6, 1, 0 }
   0xc   : > { %p750_p7 = pneg %p1053_p6  ;;  %s234_s12 = sshll.u32 %s970_s11, 4  ;;  %s1065_s12 = int_to_ptr.vmem [resolvable:$true] %s234_s12 }
   0xd   : > { %s813_s15 = scalar_lea.hbm %s1261_s3, 512 }
   0xe   : > { %p1061_p8 = pnand %p750_p7, %p1266_p1  ;;  %p814_p9 = scmp.ne.s32.totalorder %s1261_s3, %s813_s15 }
   0xf   : > { %p820_p13 = scmp.lt.u32.totalorder %s813_s15, %s1261_s3 }
  0x10   : > { %p815_p10 = pneg %p1061_p8 }
  0x12   : > { %p816_p11 = pnand %p815_p10, %p814_p9 }
  0x14   : > { %p817_p12 = pneg %p816_p11 }
  0x16   : > { %p822_p0 = pnand %p820_p13, %p817_p12 }
  0x18   : > { %825 = shalt.err (!%p822_p0)
}
  0x19   : > { %s826_s20 = scalar_lea.vmem %s219_s9, 512  ;;  %p834_p4 = scmp.lt.s32.totalorder %s219_s9, %s219_s9 }
  0x1a   : > { %p827_p2 = scmp.ne.s32.totalorder %s219_s9, %s826_s20  ;;  %p835_p1 = scmp.lt.s32.totalorder %s826_s20, %s826_s20 }
  0x1c   : > { %p829_p3 = pnand %p827_p2, %p815_p10  ;;  %p836_p5 = por %p835_p1, %p834_p4 }
  0x1e   : > { %p830_p7 = pneg %p829_p3 }
  0x20   : > { %p837_p6 = pnand %p836_p5, %p830_p7 }
  0x22   : > { %840 = shalt.err (!%p837_p6)
}
  0x23   : > { %s971_s21 = smov 128   ;;  %s972_s22 = smov 8  }
  0x24   : > { %753 = dma.hbm_to_vmem [thread:$0]  (!%p1061_p8), %s1261_s3, 512, %s219_s9, [#allocation7], %s971_s21, %s971_s21, %s972_s22  }
  0x25   : > { %s841_s13 = scalar_lea.hbm %s1263_s5, 512 }
  0x26   : > { %p842_p9 = scmp.ne.s32.totalorder %s1263_s5, %s841_s13  ;;  %p848_p5 = scmp.lt.u32.totalorder %s841_s13, %s1263_s5 }
  0x28   : > { %p844_p1 = pnand %p842_p9, %p815_p10 }
  0x2a   : > { %p845_p4 = pneg %p844_p1 }
  0x2c   : > { %p850_p6 = pnand %p848_p5, %p845_p4 }
  0x2e   : > { %853 = shalt.err (!%p850_p6)
}
  0x2f   : > { %s854_s9 = scalar_lea.vmem %s1065_s12, 512  ;;  %p862_p0 = scmp.lt.s32.totalorder %s1065_s12, %s1065_s12 }
  0x30   : > { %p855_p11 = scmp.ne.s32.totalorder %s1065_s12, %s854_s9  ;;  %p863_p2 = scmp.lt.s32.totalorder %s854_s9, %s854_s9 }
  0x32   : > { %p857_p12 = pnand %p855_p11, %p815_p10  ;;  %p864_p3 = por %p863_p2, %p862_p0 }
  0x34   : > { %p858_p13 = pneg %p857_p12 }
  0x36   : > { %p865_p7 = pnand %p864_p3, %p858_p13 }
  0x38   : > { %868 = shalt.err (!%p865_p7)
}
  0x39   : > { %756 = dma.hbm_to_vmem [thread:$0]  (!%p1061_p8), %s1263_s5, 512, %s1065_s12, [#allocation7], %s971_s21, %s971_s21, %s972_s22  }
  0x3a   : > { %s1115_s20 = sadd.s32 1, %s967_s27   ;;  %s29_s23 = sadd.s32 1, %s963_s26 }
  0x3b   : > { %s26_s10 = ssub.s32 %s967_s27, %s1115_s20  ;;  %p36_p10 = scmp.ne.s32.totalorder %s963_s26, %s959_s25 }
  0x3c   : > { %p27_p9 = scmp.eq.s32.totalorder %s26_s10, 0  ;;  %p37_p1 = scmp.eq.s32.totalorder %s967_s27, 0 }
  0x3d   : > { %p763_p4 = scmp.lt.s32.totalorder %s967_s27, 2  ;;  %s251_s24 = sand.u32 1, %s963_s26  }
  0x3e   : > { %s1126_s8 = scalar_select %p27_p9, %s963_s26, %s29_s23  }
  0x3f   : > { %p38_p5 = por %p37_p1, %p36_p10  ;;  %s660_s11 = sshll.u32 %s251_s24, 4 }
  0x40   : > { %s687_s13 = sshll.u32 %s967_s27, 8  ;;  %s255_s12 = scalar_lea.vmem [#allocation3], %s660_s11 }
  0x41   : > { %s1132_s16 = scalar_lea.hbm %s1258_s0, %s687_s13  ;;  %s262_s21 = sshll.u32 %s255_s12, 4  ;;  %s1138_s21 = int_to_ptr.vmem [resolvable:$true] %s262_s21 }
  0x42   : > { %p1134_p8 = pnand %p763_p4, %p38_p5  ;;  %s1140_s27 = scalar_lea.sflag [#allocation4], %s251_s24 }
  0x43   : > { %s869_s17 = scalar_lea.hbm %s1132_s16, 256  ;;  %s874_s19 = scalar_lea.hbm %s1258_s0, 512 }
  0x44   : > { %p870_p6 = scmp.ne.s32.totalorder %s1132_s16, %s869_s17  ;;  %p871_p11 = pneg %p1134_p8 }
  0x45   : > { %p875_p0 = scmp.lt.u32.totalorder %s1132_s16, %s1258_s0  ;;  %p876_p2 = scmp.lt.u32.totalorder %s874_s19, %s869_s17 }
  0x46   : > { %p872_p12 = pnand %p871_p11, %p870_p6  ;;  %p878_p7 = scmp.lt.u32.totalorder %s869_s17, %s1132_s16 }
  0x47   : > { %p877_p3 = por %p876_p2, %p875_p0 }
  0x48   : > { %p873_p13 = pneg %p872_p12 }
  0x49   : > { %p879_p10 = por %p878_p7, %p877_p3 }
  0x4b   : > { %p880_p9 = pnand %p879_p10, %p873_p13 }
  0x4d   : > { %883 = shalt.err (!%p880_p9)
}
  0x4e   : > { %s884_s24 = scalar_lea.vmem %s1138_s21, 256  ;;  %s973_s11 = smov [#allocation3]  }
  0x4f   : > { %p885_p1 = scmp.ne.s32.totalorder %s1138_s21, %s884_s24  ;;  %s889_s13 = sshll.u32 %s973_s11, 4  ;;  %s890_s13 = int_to_ptr.vmem [resolvable:$false] %s889_s13 }
  0x50   : > { %s891_s14 = scalar_lea.vmem %s890_s13, 512  ;;  %p892_p6 = scmp.lt.s32.totalorder %s1138_s21, %s890_s13 }
  0x51   : > { %p887_p4 = pnand %p885_p1, %p871_p11  ;;  %p893_p12 = scmp.lt.s32.totalorder %s891_s14, %s884_s24 }
  0x53   : > { %p888_p5 = pneg %p887_p4  ;;  %p894_p0 = por %p893_p12, %p892_p6 }
  0x55   : > { %p895_p2 = pnand %p894_p0, %p888_p5 }
  0x57   : > { %898 = shalt.err (!%p895_p2)
}
  0x58   : > { %s974_s15 = smov 32   ;;  %s975_s12 = smov 2  }
  0x59   : > { %760 = dma.hbm_to_vmem [thread:$0]  (!%p1134_p8), %s1132_s16, 256, %s1138_s21, %s1140_s27, %s974_s15, %s974_s15, %s975_s12  }
  0x5a   : > { %p1273_p11 = scmp.ne.s32.totalorder %s1270_s30, 0 }
  0x5b   : > { %s276_s17 = sand.u32 (!%p1273_p11), 1, %s959_s25   ;;  %p1274_p13 = scmp.ne.s32.totalorder (!%p1273_p11), %s1269_s29, 0 }
  0x5c   : > { %274 = sbr.rel (%p1273_p11) target bundleno = 910 (0x38e), region = 48  ;;  %s664_s9 = sshll.u32 (!%p1273_p11), %s276_s17, 4 }
  0x5d   : > { %s277_s18 = scalar_lea.sflag (!%p1273_p11), [#allocation4], %s276_s17  ;;  %s280_s19 = scalar_lea.vmem (!%p1273_p11), [#allocation3], %s664_s9 }
  0x63   : > { %942 = dma.done.wait (%p1274_p13), %s277_s18, 256  }
  0x64   : > { %944 = vsyncadd (%p1274_p13), %s277_s18, 4294967040  ;;  %p1275_p3 = scmp.eq.s32.totalorder %s1040_s28, 0 }
  0x66   : > { %946 = dma.done.wait (%p1275_p3), [#allocation7], 1024   ;;  %p1276_p7 = pmov %p1275_p3 }
  0x67   : > { %p1277_p8 = scmp.ne.s32.totalorder %s1040_s28, 0 }
  0x68   : > { %948 = vsyncadd (%p1276_p7), [#allocation7], 4294966272  ;;  %vm319_vm0 = vcmask (!%p1277_p8), 254976   ;;  %v976_v0 = vmov (!%p1277_p8), 0.0  }
  0x69   : > { %318 = sbr.rel (%p1277_p8) target bundleno = 112 (0x70), region = 64  ;;  %320 = vst.msk [vmem:[#allocation2] sm:$0x3] (!%p1277_p8), %vm319_vm0, %v976_v0 }
  0x70 PF: > { %v322_v1 = vld [vmem:[%s280_s19] sm:$0x3]  ;;  %v323_v2 = vld [vmem:[%s280_s19 + $0x2] sm:$0x3]  ;;  %v324_v3 = vld [vmem:[%s280_s19 + $0x4] sm:$0x3] }
  0x71   : > { %v325_v4 = vld [vmem:[%s280_s19 + $0x6] sm:$0x3]  ;;  %vm330_vm1 = vcmask 254976   ;;  %v326_v8 = vld [vmem:[%s280_s19 + $0x8] sm:$0x3]  ;;  %p668_p10 = scmp.ne.s32.totalorder %s1040_s28, 1 }
  0x72   : > { %v331_v5 = vsel %vm330_vm1, %v322_v1, 0.0  ;;  %v332_v6 = vsel %vm330_vm1, %v323_v2, 0.0  ;;  %v334_v7 = vsel %vm330_vm1, %v324_v3, 0.0  ;;  %v336_v10 = vsel %vm330_vm1, %v325_v4, 0.0  ;;  %v327_v11 = vld [vmem:[%s280_s19 + $0xa] sm:$0x3] }
  0x73   : > { %v333_v9 = vadd.f32 %v332_v6, %v331_v5  ;;  %v338_v13 = vsel %vm330_vm1, %v326_v8, 0.0  ;;  %v328_v14 = vld [vmem:[%s280_s19 + $0xc] sm:$0x3]  ;;  %v340_v16 = vsel %vm330_vm1, %v327_v11, 0.0  ;;  %v329_v17 = vld [vmem:[%s280_s19 + $0xe] sm:$0x3] }
  0x74   : > { %v342_v19 = vsel %vm330_vm1, %v328_v14, 0.0  ;;  %v344_v21 = vsel %vm330_vm1, %v329_v17, 0.0  ;;  %v321_v23 = vld [vmem:[#allocation2] sm:$0x3]  ;;  %v384_v34 = vld [vmem:[#allocation6] sm:$0xff] (!%p668_p10)  ;;  %v385_v35 = vld [vmem:[#allocation6 + $0x8] sm:$0xff] (!%p668_p10) }
  0x75   : > { %v335_v12 = vadd.f32 %v334_v7, %v333_v9  ;;  %vm395_vm2 = vcmask (!%p668_p10), 261120   ;;  %v721_v36 = vpack.c.bf16 (!%p668_p10), %v385_v35, %v384_v34  ;;  %v977_v37 = vmov (!%p668_p10), 0.0|0.0   ;;  %v386_v40 = vld [vmem:[#allocation6 + $0x10] sm:$0xff] (!%p668_p10)  ;;  %v387_v41 = vld [vmem:[#allocation6 + $0x18] sm:$0xff] (!%p668_p10)  ;;  %v481_v43 = vld [vmem:[#allocation8] sm:$0xff] (!%p668_p10) }
  0x76   : > { %720 = vmatprep.subr.bf16.mxu0 (!%p668_p10), %v977_v37  ;;  %vm1195_vm3 = vmpackc.low (!%p668_p10), %vm395_vm2, %vm395_vm2  ;;  %728 = vmatprep.subr.bf16.mxu1 (!%p668_p10), %v977_v37  ;;  %vm978_vm4 = vmmov (!%p668_p10), 0   ;;  %v979_v39 = vmov (!%p668_p10), 0.0   ;;  %v725_v42 = vpack.c.bf16 (!%p668_p10), %v387_v41, %v386_v40  ;;  %v482_v44 = vld [vmem:[#allocation8 + $0x8] sm:$0xff] (!%p668_p10)  ;;  %v483_v46 = vld [vmem:[#allocation8 + $0x10] sm:$0xff] (!%p668_p10) }
  0x77   : > { %v337_v15 = vadd.f32 %v336_v10, %v335_v12  ;;  %723 = vmatpush3.bf16.xpose.msk.msra.mxu0 (!%p668_p10), %vm1195_vm3, %v721_v36  ;;  %706 = vmatprep.mubr.msk.f32.mxu0 (!%p668_p10), %vm978_vm4, %v979_v39  ;;  %v729_v45 = vpack.c.bf16 (!%p668_p10), %v482_v44, %v481_v43  ;;  %v484_v47 = vld [vmem:[#allocation8 + $0x18] sm:$0xff] (!%p668_p10) }
  0x78   : > { %724 = vmatprep.subr.bf16.mxu0 (!%p668_p10), %v977_v37  ;;  %717 = vmatprep.mubr.msk.f32.mxu1 (!%p668_p10), %vm978_vm4, %v979_v39  ;;  %v733_v48 = vpack.c.bf16 (!%p668_p10), %v484_v47, %v483_v46  ;;  %v669_v53 = vld [vmem:[%s1259_s1] ss:$0 sm:$0xff] (!%p668_p10) }
  0x79   : > { %v339_v18 = vadd.f32 %v338_v13, %v337_v15  ;;  %731 = vmatpush3.bf16.xpose.msk.msra.mxu1 (!%p668_p10), %vm1195_vm3, %v729_v45  ;;  %v670_v55 = vld [vmem:[%s1260_s2] ss:$0 sm:$0xff] (!%p668_p10) }
  0x7a   : > { %732 = vmatprep.subr.bf16.mxu1 (!%p668_p10), %v977_v37  ;;  %v671_v58 = vld [vmem:[%s1262_s4] ss:$0 sm:$0xff] (!%p668_p10) }
  0x7b   : > { %v341_v20 = vadd.f32 %v340_v16, %v339_v18  ;;  %v677_v62 = vld [vmem:[%s1264_s6] ss:$0 sm:$0xff] (!%p668_p10) }
  0x7d   : > { %v343_v22 = vadd.f32 %v342_v19, %v341_v20  ;;  %351 = sbr.rel (%p668_p10) target bundleno = 885 (0x375), region = 68 }
  0x7f   : > { %v345_v24 = vadd.f32 %v344_v21, %v343_v22  ;;  %727 = vmatpush3.bf16.xpose.msk.msra.mxu0 (!%p668_p10), %vm1195_vm3, %v725_v42 }
  0x81   : > { %v346_v25 = vadd.f32 %v345_v24, %v321_v23  ;;  %735 = vmatpush3.bf16.xpose.msk.msra.mxu1 (!%p668_p10), %vm1195_vm3, %v733_v48 }
  0x83   : > { %347 = vst.msk [vmem:[#allocation2] sm:$0x3] %vm330_vm1, %v346_v25 }
  0x8a   : > { %v352_v26 = vld [vmem:[#allocation2] sm:$0x3] }
  0x8b   : > { %v353_v27 = vmul.f32 0.0625, %v352_v26 }
  0x8d   : > { %v354_v28 = vsel %vm330_vm1, %v353_v27, 0.0 }
  0x8e   : > { %355 = vadd.xlane.f32.xlu0 %v354_v28 }
 0x11b   : > { %v356_v29 = vpop.xlane.xlu0 %355 }
 0x11c   : > { %v358_v30 = vmul.f32 0.03125, %v356_v29 }
 0x11e   : > { %v359_v31 = vsub.f32 %v353_v27, %v358_v30 }
 0x120   : > { %v360_v32 = vmul.f32 %v359_v31, %v359_v31 }
 0x122   : > { %v361_v33 = vsel %vm330_vm1, %v360_v32, 0.0 }
 0x123   : > { %362 = vadd.xlane.f32.xlu0 %v361_v33 }
 0x1b0   : > { %v363_v49 = vpop.xlane.xlu0 %362 }
 0x1b1   : > { %v364_v50 = vmul.f32 0.03125, %v363_v49 }
 0x1b3   : > { %v365_v51 = vadd.f32 1e-05, %v364_v50 }
 0x1b5   : > { %811 = vrsqrt.f32 %v365_v51 }
 0x1bf   : > { %v812_v52 = vpop.eup %811 }
 0x1c0   : > { %v367_v54 = vmul.f32 %v812_v52, %v359_v31 }
 0x1c2   : > { %v375_v56 = vmul.f32 %v669_v53, %v367_v54 }
 0x1c4   : > { %v383_v57 = vadd.f32 %v670_v55, %v375_v56 }
 0x1c6   : > { %707 = vmatmul.mubr.msk.f32.vlgmr.msra.gmra.mrb[0].mxu0 %vm395_vm2, %v383_v57 }
 0x299   : > { %v477_v59 = vpop.f32.mrb[0].mxu0 }
 0x29a   : > { %v478_v60 = vadd.f32 %v671_v58, %v477_v59  ;;  %v708_v61 = vpop.f32.mrb[1].mxu0 }
 0x29c   : > { %718 = vmatmul.mubr.msk.f32.vlgmr.msra.gmra.mrb[0].mxu1 %vm395_vm2, %v478_v60 }
 0x36f   : > { %v573_v63 = vpop.f32.mrb[0].mxu1 }
 0x370   : > { %v574_v0 = vadd.f32 %v677_v62, %v573_v63  ;;  %v719_v1 = vpop.f32.mrb[1].mxu1 }
 0x372   : > { %v577_v2 = vmax.f32 %v574_v0, 0.0 }
 0x374   : > { %578 = vst.msk [vmem:[#allocation9] sm:$0x3] %vm330_vm1, %v577_v2 }
 0x375 PF: > { %p766_p9 = scmp.eq.s32.totalorder %s1040_s28, 1  ;;  %s980_s24 = smov [#allocation9]  }
 0x376   : > { %s586_s11 = sshll.u32 %s980_s24, 4  ;;  %s587_s11 = int_to_ptr.vmem [resolvable:$true] %s586_s11 }
 0x377   : > { %s899_s13 = scalar_lea.vmem %s587_s11, 32  ;;  %p906_p6 = scmp.lt.s32.totalorder %s587_s11, %s587_s11 }
 0x378   : > { %p900_p1 = scmp.ne.s32.totalorder %s587_s11, %s899_s13  ;;  %p907_p12 = scmp.lt.s32.totalorder %s899_s13, %s899_s13 }
 0x37a   : > { %p901_p4 = pnand %p900_p1, %p766_p9  ;;  %p908_p0 = por %p907_p12, %p906_p6 }
 0x37c   : > { %p902_p5 = pneg %p901_p4 }
 0x37e   : > { %p909_p2 = pnand %p908_p0, %p902_p5 }
 0x380   : > { %912 = shalt.err (!%p909_p2)
}
 0x381   : > { %s913_s12 = scalar_lea.hbm %s1265_s7, 32 }
 0x382   : > { %p914_p11 = scmp.ne.s32.totalorder %s1265_s7, %s913_s12  ;;  %p919_p7 = scmp.lt.u32.totalorder %s913_s12, %s1265_s7 }
 0x384   : > { %p915_p13 = pnand %p914_p11, %p766_p9 }
 0x386   : > { %p916_p3 = pneg %p915_p13 }
 0x388   : > { %p921_p8 = pnand %p919_p7, %p916_p3 }
 0x38a   : > { %924 = shalt.err (!%p921_p8)
}
 0x38b   : > { %747 = dma.vmem_to_hbm [thread:$0]  (%p766_p9), %s587_s11, 32, %s1265_s7, [#allocation5]  }
 0x38c   : > { %950 = dma.done.wait (%p766_p9), [#allocation5], 32  }
 0x38d   : > { %952 = vsyncadd (%p766_p9), [#allocation5], 4294967264 }
 0x38e PF: > { %p19_p10 = scmp.ge.s32.totalorder %s1115_s20, 4   ;;  %s1280_s24 = smov %s959_s25 }
 0x38f   : > { %s1281_s25 = smov %s963_s26  ;;  %s1282_s26 = smov %s1126_s8 }
 0x390   : > { %s1283_s27 = smov %s1115_s20  ;;  %21 = sbr.rel (!%p19_p10) target bundleno = 5 (0x5), region = 101 }
 0x397   :  { %599 = vsyncpa [#allocation4], 1 }
 0x398   :  { %601 = vsyncpa [#allocation4 + $0x1], 1 }
 0x399   :  { %602 = vsyncpa [#allocation7], 1 }
 0x39a   :  { %603 = vsyncpa [#allocation5], 1 }
 0x39b   :  { %605 = vsyncpa [#allocation5 + $0x1], 1 }

</bundles_post_ra>
